<compile_context>
chip_gen: v7x
topology: tpu7x:2x2x1
jax: 0.10.0
libtpu: 0.0.40
codegen_flags: <defaults>
</compile_context>

<pallas_src>
import functools

import jax
import jax.numpy as jnp
from jax.experimental import pallas as pl
from jax.experimental.pallas import tpu as pltpu

_MIB = 1024 * 1024


# ------------------------------- kernels ----------------------------------- #
def _expand_shuffle_kernel(x_ref, w_ref, o_ref, *, tile_r, W, scale, c_out):
    """Bias-free Linear expand (MXU) + fused PixelShuffle write-out.

    x_ref : (tile_r * W, dim)                flattened pixels of tile_r image rows
    w_ref : (dim, dim_interm)                (K, N) weight, columns in (i, j, c) order
    o_ref : (tile_r, scale, W, scale*c_out)  final PixelShuffle memory layout
    """
    acc = jnp.dot(x_ref[...], w_ref[...], preferred_element_type=jnp.float32)
    # Split the flattened pixel rows back into (image_row, column).  The wrapper
    # only takes this path when W is a multiple of 8, so the reshape is
    # tile-aligned (metadata-only relayout).
    acc = acc.reshape(tile_r, W, scale * scale * c_out)
    sc = scale * c_out
    for i in range(scale):                       # static unroll; scale is small (2/4)
        # Upsampled row (h*scale + i) is the i-th (scale*c_out)-wide column slab
        # of every pixel in image row h.
        o_ref[:, i, :, :] = acc[:, :, i * sc:(i + 1) * sc].astype(o_ref.dtype)


def _expand_kernel(x_ref, w_ref, o_ref):
    """Fallback: plain M-tiled matmul; PixelShuffle interleave applied outside."""
    o_ref[...] = jnp.dot(x_ref[...], w_ref[...],
                         preferred_element_type=jnp.float32).astype(o_ref.dtype)


# ---------------------------- sizing helpers -------------------------------- #
def _round_up(x, m):
    return ((x + m - 1) // m) * m


def _sublane(itemsize):
    # Sublane packing per dtype width: 8 rows (f32), 16 (bf16), 32 (int8/fp8).
    return {4: 8, 2: 16, 1: 32}.get(itemsize, 8)


def _vmem_budgets():
    """Generation-aware VMEM budgets (v5e/v6e: 128 MiB physical, v7x: 64 MiB)."""
    try:
        cap = int(pltpu.get_tpu_info().vmem_capacity_bytes)
    except Exception:
        cap = 64 * _MIB                      # conservative (v7x-sized) fallback
    tile_budget = (3 * cap) // 8             # 48 MiB on v5e/v6e, 24 MiB on v7x
    limit_cap = (3 * cap) // 4               # 96 MiB on v5e/v6e, 48 MiB on v7x
    return tile_budget, limit_cap


def _block_bytes(in_rows, dim, dim_interm, out_elems, itemsize):
    """Approximate per-step VMEM footprint (double-buffered in/out + weight)."""
    x_tile = in_rows * _round_up(dim, 128)
    w_full = _round_up(dim, 8) * _round_up(dim_interm, 128)
    acc_f32 = in_rows * _round_up(dim_interm, 128)       # f32 matmul result
    return (2 * (x_tile + out_elems) + 2 * w_full) * itemsize + 4 * acc_f32


def _pick_tile_rows(n_rows, W, dim, dim_interm, scale, c_out, itemsize,
                    tile_budget, max_tile_rows):
    """Largest sublane-aligned count of image rows per step that fits VMEM."""
    sub = _sublane(itemsize)
    if max_tile_rows is None:
        max_tile_rows = max(sub, 4096 // max(W, 1))      # ~4K flattened rows/step
    tile_r = min(n_rows, max_tile_rows)
    if tile_r < n_rows:
        tile_r = max(sub, (tile_r // sub) * sub)

    def bytes_for(tr):
        out_elems = tr * scale * _round_up(W, 8) * _round_up(scale * c_out, 128)
        return _block_bytes(tr * W, dim, dim_interm, out_elems, itemsize)

    while tile_r > sub and bytes_for(tile_r) > tile_budget:
        tile_r = max(sub, ((tile_r // 2) // sub) * sub)
    tile_r = min(tile_r, n_rows)
    return tile_r, bytes_for(tile_r)


# --------------------------- parameter preparation ------------------------- #
def prepare_expand_weight(weight, scale):
    """One-time prep of the nn.Linear weight (PyTorch layout (dim_interm, dim)).

    Returns the weight in canonical (K, N) = (dim, dim_interm) layout with the
    output columns permuted from PixelShuffle's (c_out, i, j) order into
    (i, j, c_out) order.  Hoist this out of the per-step forward — it is a full
    weight-sized copy and only needs to happen once per parameter update.
    """
    dim_interm, _ = weight.shape
    assert dim_interm % (scale * scale) == 0, "dim_interm must be divisible by scale**2"
    c_out = dim_interm // (scale * scale)
    perm = jnp.transpose(
        jnp.arange(dim_interm).reshape(c_out, scale, scale), (1, 2, 0)
    ).reshape(-1)
    return jnp.transpose(weight[perm])                   # (dim, dim_interm)


# ------------------------------ forward pass -------------------------------- #
def patch_expand_prepared(x, w_kn, scale, *, max_tile_rows=None):
    """PatchExpand forward with a pre-prepared (K, N) weight.

    x    : (B, L, dim) with L = H*W, H == W
    w_kn : (dim, dim_interm) from prepare_expand_weight()
    out  : (B, L*scale**2, dim_interm // scale**2)
    """
    B, L, dim = x.shape
    H = W = int(round(L ** 0.5))
    assert H * W == L, "L must be a perfect square"
    dim_k, dim_interm = w_kn.shape
    assert dim_k == dim, "weight/input feature mismatch"
    assert dim_interm % (scale * scale) == 0
    c_out = dim_interm // (scale * scale)
    n_rows = B * H
    itemsize = jnp.dtype(x.dtype).itemsize
    x2d = x.reshape(n_rows * W, dim)

    tile_budget, limit_cap = _vmem_budgets()

    if W % 8 != 0:
        # TODO(synk): fuse the shuffle for W not a multiple of 8 as well; fall
        # back to the unfused (matmul kernel + XLA interleave) path for now.
        return _patch_expand_fallback(x2d, w_kn, B, H, W, dim, dim_interm, c_out,
                                      scale, itemsize, tile_budget, limit_cap)

    tile_r, blk_bytes = _pick_tile_rows(n_rows, W, dim, dim_interm, scale, c_out,
                                        itemsize, tile_budget, max_tile_rows)
    grid = (pl.cdiv(n_rows, tile_r),)
    vmem_limit = int(min(max(2 * blk_bytes, 32 * _MIB), limit_cap))

    kernel = functools.partial(_expand_shuffle_kernel,
                               tile_r=tile_r, W=W, scale=scale, c_out=c_out)
    out4d = pl.pallas_call(
        kernel,
        out_shape=jax.ShapeDtypeStruct((n_rows, scale, W, scale * c_out), x.dtype),
        grid=grid,
        in_specs=[
            pl.BlockSpec((tile_r * W, dim), lambda r: (r, 0)),   # row-aligned M tile
            pl.BlockSpec((dim, dim_interm), lambda r: (0, 0)),   # resident weight
        ],
        out_specs=pl.BlockSpec((tile_r, scale, W, scale * c_out),
                               lambda r: (r, 0, 0, 0)),          # final layout
        compiler_params=pltpu.CompilerParams(
            dimension_semantics=("parallel",),
            vmem_limit_bytes=vmem_limit,
        ),
        cost_estimate=pl.CostEstimate(
            flops=2 * n_rows * W * dim * dim_interm,
            transcendentals=0,
            bytes_accessed=itemsize * (n_rows * W * (dim + dim_interm)
                                       + dim * dim_interm),
        ),
    )(x2d, w_kn)

    # Pure reshape, no data movement: (B*H, s, W, s*c_out) row-major is exactly
    # the final (B, H, s, W, s, c_out) = (B, L*s*s, c_out) layout.
    return out4d.reshape(B, L * scale * scale, c_out)


def _patch_expand_fallback(x2d, w_kn, B, H, W, dim, dim_interm, c_out, scale,
                           itemsize, tile_budget, limit_cap):
    """Unfused path for W not a multiple of 8 (matmul kernel + XLA interleave)."""
    M = x2d.shape[0]
    sub = _sublane(itemsize)
    tile_m = min(M, 1024)
    if tile_m < M:
        tile_m = max(sub, (tile_m // sub) * sub)

    def bytes_for(tm):
        return _block_bytes(tm, dim, dim_interm,
                            tm * _round_up(dim_interm, 128), itemsize)

    while tile_m > sub and bytes_for(tile_m) > tile_budget:
        tile_m = max(sub, ((tile_m // 2) // sub) * sub)
    tile_m = min(tile_m, M)
    vmem_limit = int(min(max(2 * bytes_for(tile_m), 32 * _MIB), limit_cap))

    y = pl.pallas_call(
        _expand_kernel,
        out_shape=jax.ShapeDtypeStruct((M, dim_interm), x2d.dtype),
        grid=(pl.cdiv(M, tile_m),),
        in_specs=[pl.BlockSpec((tile_m, dim), lambda i: (i, 0)),
                  pl.BlockSpec((dim, dim_interm), lambda i: (0, 0))],
        out_specs=pl.BlockSpec((tile_m, dim_interm), lambda i: (i, 0)),
        compiler_params=pltpu.CompilerParams(
            dimension_semantics=("parallel",),
            vmem_limit_bytes=vmem_limit,
        ),
        cost_estimate=pl.CostEstimate(
            flops=2 * M * dim * dim_interm,
            transcendentals=0,
            bytes_accessed=itemsize * (M * (dim + dim_interm) + dim * dim_interm),
        ),
    )(x2d, w_kn)

    y = y.reshape(B, H, W, scale, scale, c_out)
    y = jnp.transpose(y, (0, 1, 3, 2, 4, 5))
    return y.reshape(B, H * W * scale * scale, c_out)


def patch_expand(x, weight, scale, *, max_tile_rows=None):
    """Drop-in forward taking the raw PyTorch-layout weight (dim_interm, dim).

    For repeated calls with static weights, call prepare_expand_weight() once
    and use patch_expand_prepared() instead.
    """
    return patch_expand_prepared(x, prepare_expand_weight(weight, scale), scale,
                                 max_tile_rows=max_tile_rows)


# -------------------------------- reference --------------------------------- #
def patch_expand_ref(x, weight, scale):
    """Torch-faithful reference (unpermuted weight + NCHW PixelShuffle chain)."""
    B, L, dim = x.shape
    H = W = int(round(L ** 0.5))
    dim_interm = weight.shape[0]
    c_out = dim_interm // (scale * scale)
    y = jnp.einsum("blc,oc->blo", x, weight)
    y = jnp.transpose(y, (0, 2, 1)).reshape(B, dim_interm, H, W)
    y = y.reshape(B, c_out, scale, scale, H, W)
    y = jnp.transpose(y, (0, 1, 4, 2, 5, 3)).reshape(B, c_out, H * scale, W * scale)
    y = y.reshape(B, c_out, -1)
    return jnp.transpose(y, (0, 2, 1))


# ---------------------------------- main ------------------------------------ #
def _run_case(key, *, B, H, dim, dim_out, scale, dtype, max_tile_rows, tol):
    assert dim // dim_out == scale or dim == dim_out, "dimension mismatch"
    dim_interm = dim * scale * scale if dim == dim_out else dim * scale
    c_out = dim_interm // (scale * scale)
    L = H * H
    kx, kw = jax.random.split(key)
    x = jax.random.normal(kx, (B, L, dim), dtype=jnp.float32)
    w = jax.random.normal(kw, (dim_interm, dim), dtype=jnp.float32) * (dim ** -0.5)

    # One-time parameter prep, hoisted out of the per-call forward.
    w_kn = prepare_expand_weight(w.astype(dtype), scale)
    fwd = jax.jit(functools.partial(patch_expand_prepared, scale=scale,
                                    max_tile_rows=max_tile_rows))
    out = jax.block_until_ready(fwd(x.astype(dtype), w_kn))

    ref = patch_expand_ref(x, w, scale)
    assert out.shape == (B, L * scale * scale, c_out), out.shape
    assert jnp.allclose(out.astype(jnp.float32), ref, atol=tol, rtol=tol), (
        f"mismatch vs reference (dtype={dtype}, shape={out.shape})")


if __name__ == "__main__":
    keys = jax.random.split(jax.random.PRNGKey(0), 4)

    # dim != dim_out branch (dim_interm = dim*scale); single-block grid.
    _run_case(keys[0], B=2, H=8, dim=32, dim_out=16, scale=2,
              dtype=jnp.float32, max_tile_rows=None, tol=1e-4)
    # dim == dim_out branch (dim_interm = dim*scale**2); 4-step row-tiled grid.
    _run_case(keys[1], B=2, H=16, dim=32, dim_out=32, scale=2,
              dtype=jnp.float32, max_tile_rows=8, tol=1e-4)
    # bf16 activations/weights with f32 MXU accumulation; 2-step grid.
    _run_case(keys[2], B=2, H=16, dim=64, dim_out=32, scale=2,
              dtype=jnp.bfloat16, max_tile_rows=16, tol=5e-2)
    # Row count not a multiple of the tile: exercises the clipped final block.
    _run_case(keys[3], B=3, H=8, dim=32, dim_out=16, scale=2,
              dtype=jnp.float32, max_tile_rows=16, tol=1e-4)

    print("KERNEL_OK")
</pallas_src>

<mosaic_0001>
module attributes {stable_mosaic.version = 11 : i64} {
  func.func @_expand_shuffle_kernel(%arg0: i32, %arg1: memref<128x32xf32, #tpu.memory_space<vmem>>, %arg2: memref<32x64xf32, #tpu.memory_space<vmem>>, %arg3: memref<16x2x8x32xf32, #tpu.memory_space<vmem>>) attributes {dimension_semantics = [#tpu.dimension_semantics<parallel>], iteration_bounds = array<i64: 1>, scalar_prefetch = 0 : i64, scratch_operands = 0 : i64, tpu.core_type = #tpu.core_type<tc>, window_params = [{transform_indices = @transform_0, window_bounds = array<i64: 128, 32>}, {pipeline_mode = #tpu.pipeline_mode<synchronous>, transform_indices = @transform_1, window_bounds = array<i64: 32, 64>}, {transform_indices = @transform_2, window_bounds = array<i64: 16, 2, 8, 32>}]} {
    %c0 = arith.constant 0 : index
    %c0_0 = arith.constant 0 : index
    %0 = vector.load %arg1[%c0, %c0_0] : memref<128x32xf32, #tpu.memory_space<vmem>>, vector<128x32xf32>
    %c0_1 = arith.constant 0 : index
    %c0_2 = arith.constant 0 : index
    %1 = vector.load %arg2[%c0_1, %c0_2] : memref<32x64xf32, #tpu.memory_space<vmem>>, vector<32x64xf32>
    %cst = arith.constant dense<0.000000e+00> : vector<128x64xf32>
    %2 = tpu.matmul %0, %1, %cst {dimension_numbers = #tpu.dot_dimension_numbers<[1], [0], [0], [1], [0, 0, 1, 1], [], []>} : vector<128x32xf32>, vector<32x64xf32>, vector<128x64xf32> -> vector<128x64xf32>
    %3 = vector.shape_cast %2 : vector<128x64xf32> to vector<16x8x64xf32>
    %4 = vector.extract_strided_slice %3 {offsets = [0, 0, 0], sizes = [16, 8, 32], strides = [1, 1, 1]} : vector<16x8x64xf32> to vector<16x8x32xf32>
    %c0_3 = arith.constant 0 : index
    %c0_4 = arith.constant 0 : index
    %c0_5 = arith.constant 0 : index
    %c0_6 = arith.constant 0 : index
    %5 = vector.load %arg3[%c0_3, %c0_4, %c0_5, %c0_6] : memref<16x2x8x32xf32, #tpu.memory_space<vmem>>, vector<16x1x8x32xf32>
    %6 = vector.shape_cast %5 : vector<16x1x8x32xf32> to vector<16x8x32xf32>
    %7 = vector.shape_cast %4 : vector<16x8x32xf32> to vector<16x1x8x32xf32>
    tpu.vector_store %arg3[%c0_3, %c0_4, %c0_5, %c0_6], %7 {strides = array<i32>} : memref<16x2x8x32xf32, #tpu.memory_space<vmem>>, vector<16x1x8x32xf32>,
    %8 = vector.extract_strided_slice %3 {offsets = [0, 0, 32], sizes = [16, 8, 32], strides = [1, 1, 1]} : vector<16x8x64xf32> to vector<16x8x32xf32>
    %c0_7 = arith.constant 0 : index
    %c1 = arith.constant 1 : index
    %c0_8 = arith.constant 0 : index
    %c0_9 = arith.constant 0 : index
    %9 = vector.load %arg3[%c0_7, %c1, %c0_8, %c0_9] : memref<16x2x8x32xf32, #tpu.memory_space<vmem>>, vector<16x1x8x32xf32>
    %10 = vector.shape_cast %9 : vector<16x1x8x32xf32> to vector<16x8x32xf32>
    %11 = vector.shape_cast %8 : vector<16x8x32xf32> to vector<16x1x8x32xf32>
    tpu.vector_store %arg3[%c0_7, %c1, %c0_8, %c0_9], %11 {strides = array<i32>} : memref<16x2x8x32xf32, #tpu.memory_space<vmem>>, vector<16x1x8x32xf32>,
    return
  }
  func.func @transform_0(%arg0: i32) -> (i32, i32) {
    %c0_i32 = arith.constant 0 : i32
    %c0_i32_0 = arith.constant 0 : i32
    return %arg0, %c0_i32 : i32, i32
  }
  func.func @transform_1(%arg0: i32) -> (i32, i32) {
    %c0_i32 = arith.constant 0 : i32
    %c0_i32_0 = arith.constant 0 : i32
    %c0_i32_1 = arith.constant 0 : i32
    return %c0_i32, %c0_i32_0 : i32, i32
  }
  func.func @transform_2(%arg0: i32) -> (i32, i32, i32, i32) {
    %c0_i32 = arith.constant 0 : i32
    %c0_i32_0 = arith.constant 0 : i32
    %c0_i32_1 = arith.constant 0 : i32
    %c0_i32_2 = arith.constant 0 : i32
    return %arg0, %c0_i32, %c0_i32_0, %c0_i32_1 : i32, i32, i32, i32
  }
}

</mosaic_0001>

<bundles_post_ra>
// kernel: patch_expand_prepared.1
= control target key start
LH: loop header
LB: loop body
LE: loop exit
PB: predicated region body
PF: predicated region fallthrough
CT: control target
= control target key end

     0   :  { %vm31_vm0 = vcmask 261120   ;;  %s423_s23 = smov 96   ;;  %s659_s1 = inlined_call_operand.vmem [shape: f32[32,64], index: 1, kind: input, shape index: {}]   ;;  %s660_s0 = inlined_call_operand.vmem [shape: f32[128,32], index: 0, kind: input, shape index: {}]   ;;  %s661_s2 = inlined_call_operand.vmem [shape: f32[16,2,8,32], index: 2, kind: output, shape index: {}]  }
   0x1   :  { %v27_v0 = vld [vmem:[%s659_s1] sm:$0xff]  ;;  %v28_v1 = vld [vmem:[%s659_s1 + $0x8] sm:$0xff]  ;;  %v29_v2 = vld [vmem:[%s659_s1 + $0x10] sm:$0xff] }
   0x2   :  { %v410_v3 = vpack.c.bf16 %v28_v1, %v27_v0  ;;  %v30_v4 = vld [vmem:[%s659_s1 + $0x18] sm:$0xff]  ;;  %v11_v5 = vld [vmem:[%s660_s0] sm:$0xff]  ;;  %v12_v8 = vld [vmem:[%s660_s0 + $0x8] sm:$0xff] }
   0x3   :  { %v19_v6 = vld [vmem:[%s660_s0 + $0x40] sm:$0xff]  ;;  %v414_v7 = vpack.c.bf16 %v30_v4, %v29_v2  ;;  %386 = vmatprep.mubr.msk.f32.mxu0 %vm31_vm0, %v11_v5  ;;  %v20_v9 = vld [vmem:[%s660_s0 + $0x48] sm:$0xff]  ;;  %v13_v10 = vld [vmem:[%s660_s0 + $0x10] sm:$0xff] }
   0x4   :  { %398 = vmatprep.mubr.msk.f32.mxu1 %vm31_vm0, %v19_v6  ;;  %411 = vmatprep.subr.bf16.mxu0 %v410_v3  ;;  %v21_v11 = vld [vmem:[%s660_s0 + $0x50] sm:$0xff]  ;;  %v14_v12 = vld [vmem:[%s660_s0 + $0x18] sm:$0xff]  ;;  %v15_v14 = vld [vmem:[%s660_s0 + $0x20] sm:$0xff] }
   0x5   :  { %418 = vmatprep.subr.bf16.mxu1 %v410_v3  ;;  %413 = vmatpush3.bf16.msra.mxu0 %v410_v3  ;;  %v22_v13 = vld [vmem:[%s660_s0 + $0x58] sm:$0xff]  ;;  %v23_v15 = vld [vmem:[%s660_s0 + $0x60] sm:$0xff]  ;;  %v16_v16 = vld [vmem:[%s660_s0 + $0x28] sm:$0xff] }
   0x6   :  { %420 = vmatpush3.bf16.msra.mxu1 %v410_v3  ;;  %415 = vmatprep.subr.bf16.mxu0 %v414_v7  ;;  %v24_v17 = vld [vmem:[%s660_s0 + $0x68] sm:$0xff]  ;;  %v17_v18 = vld [vmem:[%s660_s0 + $0x30] sm:$0xff]  ;;  %v18_v20 = vld [vmem:[%s660_s0 + $0x38] sm:$0xff] }
   0x7   :  { %419 = vmatprep.subr.bf16.mxu1 %v414_v7  ;;  %v25_v19 = vld [vmem:[%s660_s0 + $0x70] sm:$0xff]  ;;  %v26_v21 = vld [vmem:[%s660_s0 + $0x78] sm:$0xff] }
   0x9   :  { %417 = vmatpush3.bf16.msra.mxu0 %v414_v7 }
   0xa   :  { %421 = vmatpush3.bf16.msra.mxu1 %v414_v7 }
   0xc   :  { %387 = vmatmul.mubr.msk.f32.vlgmr.msra.gmra.mrb[0].mxu0 %vm31_vm0, %v12_v8 }
   0xd   :  { %399 = vmatmul.mubr.msk.f32.vlgmr.msra.gmra.mrb[0].mxu1 %vm31_vm0, %v20_v9  ;;  %389 = vmatprep.mubr.msk.f32.mxu0 %vm31_vm0, %v13_v10 }
   0xe   :  { %401 = vmatprep.mubr.msk.f32.mxu1 %vm31_vm0, %v21_v11 }
  0x10   :  { %390 = vmatmul.mubr.msk.f32.gmra.mrb[2].mxu0 %vm31_vm0, %v14_v12 }
  0x11   :  { %402 = vmatmul.mubr.msk.f32.gmra.mrb[2].mxu1 %vm31_vm0, %v22_v13  ;;  %392 = vmatprep.mubr.msk.f32.mxu0 %vm31_vm0, %v15_v14 }
  0x12   :  { %404 = vmatprep.mubr.msk.f32.mxu1 %vm31_vm0, %v23_v15 }
  0x14   :  { %393 = vmatmul.mubr.msk.f32.gmra.mrb[4].mxu0 %vm31_vm0, %v16_v16 }
  0x15   :  { %405 = vmatmul.mubr.msk.f32.gmra.mrb[4].mxu1 %vm31_vm0, %v24_v17  ;;  %395 = vmatprep.mubr.msk.f32.mxu0 %vm31_vm0, %v17_v18 }
  0x16   :  { %407 = vmatprep.mubr.msk.f32.mxu1 %vm31_vm0, %v25_v19 }
  0x18   :  { %396 = vmatmul.mubr.msk.f32.gmra.mrb[6].mxu0 %vm31_vm0, %v18_v20 }
  0x19   :  { %408 = vmatmul.mubr.msk.f32.gmra.mrb[6].mxu1 %vm31_vm0, %v26_v21 }
  0xdf   :  { %v388_v22 = vpop.f32.mrb[0].mxu0 }
  0xe0   :  { %v400_v23 = vpop.f32.mrb[0].mxu1  ;;  %226 = vst.msk [vmem:[%s661_s2 + $0x10] sm:$0xff] %vm31_vm0, %v388_v22  ;;  %259 = vrot.lane.b32.xlu0 %v388_v22, %s423_s23  ;;  %v146_v25 = vpop.f32.mrb[1].mxu0 }
  0xe1   :  { %234 = vst.msk [vmem:[%s661_s2 + $0x90] sm:$0xff] %vm31_vm0, %v400_v23  ;;  %275 = vrot.lane.b32.xlu1 %v400_v23, %s423_s23  ;;  %v186_v24 = vpop.f32.mrb[1].mxu1  ;;  %225 = vst.msk [vmem:[%s661_s2] sm:$0xff] %vm31_vm0, %v146_v25 }
  0xe2   :  { %233 = vst.msk [vmem:[%s661_s2 + $0x80] sm:$0xff] %vm31_vm0, %v186_v24 }
  0xe3   :  { %v391_v26 = vpop.f32.mrb[2].mxu0 }
  0xe4   :  { %v403_v27 = vpop.f32.mrb[2].mxu1  ;;  %228 = vst.msk [vmem:[%s661_s2 + $0x30] sm:$0xff] %vm31_vm0, %v391_v26  ;;  %257 = vrot.lane.b32.xlu0 %v146_v25, %s423_s23  ;;  %v156_v28 = vpop.f32.mrb[3].mxu0 }
  0xe5   :  { %263 = vrot.lane.b32.xlu1 %v391_v26, %s423_s23  ;;  %236 = vst.msk [vmem:[%s661_s2 + $0xb0] sm:$0xff] %vm31_vm0, %v403_v27  ;;  %v196_v29 = vpop.f32.mrb[3].mxu1  ;;  %227 = vst.msk [vmem:[%s661_s2 + $0x20] sm:$0xff] %vm31_vm0, %v156_v28 }
  0xe6   :  { %235 = vst.msk [vmem:[%s661_s2 + $0xa0] sm:$0xff] %vm31_vm0, %v196_v29 }
  0xe7   :  { %v394_v30 = vpop.f32.mrb[4].mxu0 }
  0xe8   :  { %v406_v31 = vpop.f32.mrb[4].mxu1  ;;  %273 = vrot.lane.b32.xlu0 %v186_v24, %s423_s23  ;;  %230 = vst.msk [vmem:[%s661_s2 + $0x50] sm:$0xff] %vm31_vm0, %v394_v30  ;;  %v166_v32 = vpop.f32.mrb[5].mxu0 }
  0xe9   :  { %279 = vrot.lane.b32.xlu1 %v403_v27, %s423_s23  ;;  %238 = vst.msk [vmem:[%s661_s2 + $0xd0] sm:$0xff] %vm31_vm0, %v406_v31  ;;  %v206_v33 = vpop.f32.mrb[5].mxu1  ;;  %229 = vst.msk [vmem:[%s661_s2 + $0x40] sm:$0xff] %vm31_vm0, %v166_v32 }
  0xea   :  { %237 = vst.msk [vmem:[%s661_s2 + $0xc0] sm:$0xff] %vm31_vm0, %v206_v33 }
  0xeb   :  { %v397_v34 = vpop.f32.mrb[6].mxu0 }
  0xec   :  { %v409_v35 = vpop.f32.mrb[6].mxu1  ;;  %277 = vrot.lane.b32.xlu0 %v196_v29, %s423_s23  ;;  %232 = vst.msk [vmem:[%s661_s2 + $0x70] sm:$0xff] %vm31_vm0, %v397_v34  ;;  %v176_v36 = vpop.f32.mrb[7].mxu0 }
  0xed   :  { %261 = vrot.lane.b32.xlu1 %v156_v28, %s423_s23  ;;  %240 = vst.msk [vmem:[%s661_s2 + $0xf0] sm:$0xff] %vm31_vm0, %v409_v35  ;;  %v216_v37 = vpop.f32.mrb[7].mxu1  ;;  %231 = vst.msk [vmem:[%s661_s2 + $0x60] sm:$0xff] %vm31_vm0, %v176_v36 }
  0xee   :  { %239 = vst.msk [vmem:[%s661_s2 + $0xe0] sm:$0xff] %vm31_vm0, %v216_v37 }
  0xf0   :  { %265 = vrot.lane.b32.xlu0 %v166_v32, %s423_s23 }
  0xf1   :  { %267 = vrot.lane.b32.xlu1 %v394_v30, %s423_s23 }
  0xf4   :  { %281 = vrot.lane.b32.xlu0 %v206_v33, %s423_s23 }
  0xf5   :  { %283 = vrot.lane.b32.xlu1 %v406_v31, %s423_s23 }
  0xf8   :  { %269 = vrot.lane.b32.xlu0 %v176_v36, %s423_s23 }
  0xf9   :  { %271 = vrot.lane.b32.xlu1 %v397_v34, %s423_s23 }
  0xfc   :  { %285 = vrot.lane.b32.xlu0 %v216_v37, %s423_s23 }
  0xfd   :  { %287 = vrot.lane.b32.xlu1 %v409_v35, %s423_s23 }
 0x152   :  { %v260_v39 = vpop.permute.xlu0 %259 }
 0x153   :  { %v276_v38 = vpop.permute.xlu1 %275  ;;  %343 = vst.msk [vmem:[%s661_s2 + $0x18] sm:$0xff] %vm31_vm0, %v260_v39 }
 0x154   :  { %351 = vst.msk [vmem:[%s661_s2 + $0x98] sm:$0xff] %vm31_vm0, %v276_v38 }
 0x156   :  { %v258_v40 = vpop.permute.xlu0 %257 }
 0x157   :  { %v264_v41 = vpop.permute.xlu1 %263  ;;  %342 = vst.msk [vmem:[%s661_s2 + $0x8] sm:$0xff] %vm31_vm0, %v258_v40 }
 0x158   :  { %345 = vst.msk [vmem:[%s661_s2 + $0x38] sm:$0xff] %vm31_vm0, %v264_v41 }
 0x15a   :  { %v274_v42 = vpop.permute.xlu0 %273 }
 0x15b   :  { %v280_v43 = vpop.permute.xlu1 %279  ;;  %350 = vst.msk [vmem:[%s661_s2 + $0x88] sm:$0xff] %vm31_vm0, %v274_v42 }
 0x15c   :  { %353 = vst.msk [vmem:[%s661_s2 + $0xb8] sm:$0xff] %vm31_vm0, %v280_v43 }
 0x15e   :  { %v278_v44 = vpop.permute.xlu0 %277 }
 0x15f   :  { %v262_v45 = vpop.permute.xlu1 %261  ;;  %352 = vst.msk [vmem:[%s661_s2 + $0xa8] sm:$0xff] %vm31_vm0, %v278_v44 }
 0x160   :  { %344 = vst.msk [vmem:[%s661_s2 + $0x28] sm:$0xff] %vm31_vm0, %v262_v45 }
 0x162   :  { %v266_v47 = vpop.permute.xlu0 %265 }
 0x163   :  { %v268_v46 = vpop.permute.xlu1 %267  ;;  %346 = vst.msk [vmem:[%s661_s2 + $0x48] sm:$0xff] %vm31_vm0, %v266_v47 }
 0x164   :  { %347 = vst.msk [vmem:[%s661_s2 + $0x58] sm:$0xff] %vm31_vm0, %v268_v46 }
 0x166   :  { %v282_v49 = vpop.permute.xlu0 %281 }
 0x167   :  { %v284_v48 = vpop.permute.xlu1 %283  ;;  %354 = vst.msk [vmem:[%s661_s2 + $0xc8] sm:$0xff] %vm31_vm0, %v282_v49 }
 0x168   :  { %355 = vst.msk [vmem:[%s661_s2 + $0xd8] sm:$0xff] %vm31_vm0, %v284_v48 }
 0x16a   :  { %v270_v51 = vpop.permute.xlu0 %269 }
 0x16b   :  { %v272_v50 = vpop.permute.xlu1 %271  ;;  %348 = vst.msk [vmem:[%s661_s2 + $0x68] sm:$0xff] %vm31_vm0, %v270_v51 }
 0x16c   :  { %349 = vst.msk [vmem:[%s661_s2 + $0x78] sm:$0xff] %vm31_vm0, %v272_v50 }
 0x16e   :  { %v286_v53 = vpop.permute.xlu0 %285 }
 0x16f   :  { %v288_v52 = vpop.permute.xlu1 %287  ;;  %356 = vst.msk [vmem:[%s661_s2 + $0xe8] sm:$0xff] %vm31_vm0, %v286_v53 }
 0x170   :  { %357 = vst.msk [vmem:[%s661_s2 + $0xf8] sm:$0xff] %vm31_vm0, %v288_v52 }

</bundles_post_ra>
